<compile_context>
chip_gen: v5e
topology: v5e:2x2
jax: 0.10.0
libtpu: 0.0.40
codegen_flags: <defaults>
</compile_context>

<pallas_src>
import functools

import jax
import jax.numpy as jnp
from jax import lax
from jax.experimental import pallas as pl
from jax.experimental.pallas import tpu as pltpu


def _gcn_fused_kernel(x_ref, adj_ref, mask_ref, w_ref, b_ref, o_ref,
                      adjn_ref, dinv_ref, h_ref, *, n_layers):
    l = pl.program_id(1)

    # Once per batch element: build normalized adjacency and load activations.
    @pl.when(l == 0)
    def _prologue():
        adj = adj_ref[0]                                        # (N, N)
        n = adj.shape[0]
        row = lax.broadcasted_iota(jnp.int32, (n, n), 0)
        col = lax.broadcasted_iota(jnp.int32, (n, n), 1)
        adj = jnp.where(row == col, jnp.float32(1.0), adj)      # A + I (add_loop)
        deg = jnp.sum(adj, axis=-1, keepdims=True)              # (N, 1)
        dinv = lax.rsqrt(jnp.maximum(deg, jnp.float32(1.0)))    # clamp(deg,1)^-1/2
        adjn_ref[...] = dinv * adj                              # left-normalized
        dinv_ref[...] = dinv
        h_ref[...] = x_ref[0]                                   # padded input feats

    h = h_ref[...]                    # (N, Fpad)  carried activations
    w = w_ref[0]                      # (Fpad, Fpad)
    b = b_ref[0]                      # (1, Fpad)
    m = mask_ref[0]                   # (N, 1)

    hw = jnp.dot(h, w, preferred_element_type=jnp.float32)              # X W  (MXU)
    hw = dinv_ref[...] * hw                                             # right D^-1/2
    t = jnp.dot(adjn_ref[...], hw, preferred_element_type=jnp.float32)  # A_n (XW) (MXU)
    out = (t + b) * m                                                   # bias, node mask

    @pl.when(l != n_layers - 1)
    def _relu_and_carry():
        h_ref[...] = jnp.maximum(out, jnp.float32(0.0))

    @pl.when(l == n_layers - 1)
    def _write_out():
        o_ref[0] = out.astype(o_ref.dtype)


def _round_up(v, m):
    return (v + m - 1) // m * m


def gcn_forward(params, x, adj, mask, batch=None):
    """Matches GCN.forward: conv->relu repeated, final conv without relu.
    x: (B,N,F), adj: (B,N,N), mask: (B,N). `batch` is unused (as in PyTorch)."""
    B, N, f_in = x.shape
    L = len(params)
    f_out = params[-1][0].shape[1]
    f_max = max([f_in] + [w.shape[1] for w, _ in params])
    f_pad = _round_up(f_max, 128)

    # Pad & stack weights/biases to a common lane-dense width. Zero padding is
    # exact: padded input features / output columns stay identically zero
    # through every layer (matmul, bias, relu and mask all preserve zeros).
    w_stack = jnp.zeros((L, f_pad, f_pad), jnp.float32)
    b_stack = jnp.zeros((L, 1, f_pad), jnp.float32)
    for i, (w, b) in enumerate(params):
        w_stack = w_stack.at[i, : w.shape[0], : w.shape[1]].set(w.astype(jnp.float32))
        b_stack = b_stack.at[i, :, : b.shape[-1]].set(
            b.reshape(1, -1).astype(jnp.float32))

    x_pad = jnp.zeros((B, N, f_pad), jnp.float32).at[:, :, :f_in].set(
        x.astype(jnp.float32))
    mask3 = mask.reshape(B, N, 1).astype(jnp.float32)
    adj = adj.astype(jnp.float32)

    kernel = functools.partial(_gcn_fused_kernel, n_layers=L)
    out_pad = pl.pallas_call(
        kernel,
        out_shape=jax.ShapeDtypeStruct((B, N, f_pad), jnp.float32),
        grid_spec=pltpu.PrefetchScalarGridSpec(
            num_scalar_prefetch=0,
            grid=(B, L),                                   # L innermost: adj/x/mask
            in_specs=[                                     # re-DMA only when b changes
                pl.BlockSpec((1, N, f_pad), lambda bi, li: (bi, 0, 0)),   # x (padded)
                pl.BlockSpec((1, N, N), lambda bi, li: (bi, 0, 0)),       # adj
                pl.BlockSpec((1, N, 1), lambda bi, li: (bi, 0, 0)),       # mask
                pl.BlockSpec((1, f_pad, f_pad), lambda bi, li: (li, 0, 0)),  # W_l
                pl.BlockSpec((1, 1, f_pad), lambda bi, li: (li, 0, 0)),      # b_l
            ],
            out_specs=pl.BlockSpec((1, N, f_pad), lambda bi, li: (bi, 0, 0)),
            scratch_shapes=[
                pltpu.VMEM((N, N), jnp.float32),        # D^-1/2 (A+I), per batch
                pltpu.VMEM((N, 1), jnp.float32),        # dinv
                pltpu.VMEM((N, f_pad), jnp.float32),    # carried activations
            ],
        ),
        compiler_params=pltpu.CompilerParams(
            dimension_semantics=("parallel", "arbitrary"),
            vmem_limit_bytes=48 * 1024 * 1024,
        ),
    )(x_pad, adj, mask3, w_stack, b_stack)

    return out_pad[:, :, :f_out]


def init_gcn_params(key, num_node_features, internal_dims, hidden, output_dims):
    """Deterministic glorot-uniform weights, zero biases (PyG defaults)."""
    dims = [num_node_features] + [internal_dims] * hidden + [output_dims]
    params = []
    for i in range(len(dims) - 1):
        fin, fout = dims[i], dims[i + 1]
        key, sub = jax.random.split(key)
        scale = (6.0 / (fin + fout)) ** 0.5
        w = jax.random.uniform(sub, (fin, fout), jnp.float32, -scale, scale)
        b = jnp.zeros((1, fout), jnp.float32)
        params.append((w, b))
    return params


def _reference_forward(params, x, adj, mask):
    """Plain-JAX reference with identical DenseGCNConv semantics."""
    B, N, _ = x.shape
    m = mask.reshape(B, N, 1).astype(jnp.float32)
    eye = jnp.eye(N, dtype=jnp.float32)
    adj_sl = jnp.where(eye > 0, jnp.float32(1.0), adj)
    deg = jnp.sum(adj_sl, axis=-1, keepdims=True)
    dinv = lax.rsqrt(jnp.maximum(deg, jnp.float32(1.0)))
    adj_n = dinv * adj_sl * jnp.swapaxes(dinv, -1, -2)
    h = x
    for i, (w, b) in enumerate(params):
        hw = jnp.einsum("bnf,fo->bno", h, w, precision=lax.Precision.HIGHEST)
        t = jnp.einsum("bnm,bmo->bno", adj_n, hw, precision=lax.Precision.HIGHEST)
        out = (t + b.reshape(1, 1, -1)) * m
        h = jnp.maximum(out, 0.0) if i < len(params) - 1 else out
    return h


if __name__ == "__main__":
    key = jax.random.PRNGKey(0)

    # Module-default dims (internal_dims=128, hidden=5, output_dims=64), small B/N.
    B, N = 2, 16
    num_node_features = 4
    internal_dims = 128
    hidden = 5            # -> 6 DenseGCNConv layers total
    output_dims = 64

    k_x, k_adj, k_mask, k_p = jax.random.split(key, 4)
    x = jax.random.normal(k_x, (B, N, num_node_features), jnp.float32)
    adj = (jax.random.uniform(k_adj, (B, N, N)) > 0.5).astype(jnp.float32)
    adj = jnp.maximum(adj, jnp.swapaxes(adj, -1, -2))          # symmetric adjacency
    mask = (jax.random.uniform(k_mask, (B, N)) > 0.2).astype(jnp.float32)
    batch = jnp.zeros((B * N,), jnp.int32)                     # unused by forward

    params = init_gcn_params(k_p, num_node_features, internal_dims, hidden,
                             output_dims)

    out = gcn_forward(params, x, adj, mask, batch)
    out = jax.block_until_ready(out)
    assert out.shape == (B, N, output_dims), out.shape
    assert bool(jnp.all(jnp.isfinite(out)))

    ref = _reference_forward(params, x, adj, mask)
    assert bool(jnp.allclose(out, ref, rtol=1e-3, atol=1e-3)), (
        float(jnp.max(jnp.abs(out - ref))))

    print("KERNEL_OK")
</pallas_src>

<mosaic_0001>
module attributes {stable_mosaic.version = 11 : i64} {
  func.func @_gcn_fused_kernel(%arg0: i32, %arg1: i32, %arg2: memref<1x16x128xf32, #tpu.memory_space<vmem>>, %arg3: memref<1x16x16xf32, #tpu.memory_space<vmem>>, %arg4: memref<1x16x1xf32, #tpu.memory_space<vmem>>, %arg5: memref<1x128x128xf32, #tpu.memory_space<vmem>>, %arg6: memref<1x1x128xf32, #tpu.memory_space<vmem>>, %arg7: memref<1x16x128xf32, #tpu.memory_space<vmem>>, %arg8: memref<16x16xf32, #tpu.memory_space<vmem>>, %arg9: memref<16x1xf32, #tpu.memory_space<vmem>>, %arg10: memref<16x128xf32, #tpu.memory_space<vmem>>) attributes {dimension_semantics = [#tpu.dimension_semantics<parallel>, #tpu.dimension_semantics<arbitrary>], iteration_bounds = array<i64: 2, 6>, scalar_prefetch = 0 : i64, scratch_operands = 3 : i64, tpu.core_type = #tpu.core_type<tc>, window_params = [{transform_indices = @transform_0, window_bounds = array<i64: 1, 16, 128>}, {transform_indices = @transform_1, window_bounds = array<i64: 1, 16, 16>}, {transform_indices = @transform_2, window_bounds = array<i64: 1, 16, 1>}, {transform_indices = @transform_3, window_bounds = array<i64: 1, 128, 128>}, {transform_indices = @transform_4, window_bounds = array<i64: 1, 1, 128>}, {transform_indices = @transform_5, window_bounds = array<i64: 1, 16, 128>}]} {
    %c0_i32 = arith.constant 0 : i32
    %0 = arith.cmpi eq, %arg1, %c0_i32 : i32
    %1 = arith.extui %0 : i1 to i32
    %c0_i32_0 = arith.constant 0 : i32
    %2 = arith.cmpi ne, %1, %c0_i32_0 : i32
    scf.if %2 {
      %c0_19 = arith.constant 0 : index
      %c0_20 = arith.constant 0 : index
      %c0_21 = arith.constant 0 : index
      %26 = vector.load %arg3[%c0_19, %c0_20, %c0_21] : memref<1x16x16xf32, #tpu.memory_space<vmem>>, vector<1x16x16xf32>
      %27 = vector.shape_cast %26 : vector<1x16x16xf32> to vector<16x16xf32>
      %28 = tpu.iota {dimensions = array<i32: 0>} : vector<16x16xi32>
      %29 = tpu.iota {dimensions = array<i32: 1>} : vector<16x16xi32>
      %30 = arith.cmpi eq, %28, %29 : vector<16x16xi32>
      %cst_22 = arith.constant 1.000000e+00 : f32
      %31 = vector.broadcast %cst_22 : f32 to vector<16x16xf32>
      %32 = arith.select %30, %31, %27 : vector<16x16xi1>, vector<16x16xf32>
      %cst_23 = arith.constant dense<0.000000e+00> : vector<16xf32>
      %33 = vector.multi_reduction <add>, %32, %cst_23 [1] : vector<16x16xf32> to vector<16xf32>
      %34 = vector.shape_cast %33 : vector<16xf32> to vector<16x1xf32>
      %cst_24 = arith.constant 1.000000e+00 : f32
      %35 = vector.broadcast %cst_24 : f32 to vector<16x1xf32>
      %36 = arith.maximumf %34, %35 : vector<16x1xf32>
      %37 = math.rsqrt %36 : vector<16x1xf32>
      %38 = vector.broadcast %37 : vector<16x1xf32> to vector<16x16xf32>
      %39 = arith.mulf %38, %32 : vector<16x16xf32>
      %c0_25 = arith.constant 0 : index
      %c0_26 = arith.constant 0 : index
      %40 = vector.load %arg8[%c0_25, %c0_26] : memref<16x16xf32, #tpu.memory_space<vmem>>, vector<16x16xf32>
      tpu.vector_store %arg8[%c0_25, %c0_26], %39 {strides = array<i32>} : memref<16x16xf32, #tpu.memory_space<vmem>>, vector<16x16xf32>,
      %c0_27 = arith.constant 0 : index
      %c0_28 = arith.constant 0 : index
      %41 = vector.load %arg9[%c0_27, %c0_28] : memref<16x1xf32, #tpu.memory_space<vmem>>, vector<16x1xf32>
      tpu.vector_store %arg9[%c0_27, %c0_28], %37 {strides = array<i32>} : memref<16x1xf32, #tpu.memory_space<vmem>>, vector<16x1xf32>,
      %c0_29 = arith.constant 0 : index
      %c0_30 = arith.constant 0 : index
      %c0_31 = arith.constant 0 : index
      %42 = vector.load %arg2[%c0_29, %c0_30, %c0_31] : memref<1x16x128xf32, #tpu.memory_space<vmem>>, vector<1x16x128xf32>
      %43 = vector.shape_cast %42 : vector<1x16x128xf32> to vector<16x128xf32>
      %c0_32 = arith.constant 0 : index
      %c0_33 = arith.constant 0 : index
      %44 = vector.load %arg10[%c0_32, %c0_33] : memref<16x128xf32, #tpu.memory_space<vmem>>, vector<16x128xf32>
      tpu.vector_store %arg10[%c0_32, %c0_33], %43 {strides = array<i32>} : memref<16x128xf32, #tpu.memory_space<vmem>>, vector<16x128xf32>,
    } else {
    }
    %c0 = arith.constant 0 : index
    %c0_1 = arith.constant 0 : index
    %3 = vector.load %arg10[%c0, %c0_1] : memref<16x128xf32, #tpu.memory_space<vmem>>, vector<16x128xf32>
    %c0_2 = arith.constant 0 : index
    %c0_3 = arith.constant 0 : index
    %c0_4 = arith.constant 0 : index
    %4 = vector.load %arg5[%c0_2, %c0_3, %c0_4] : memref<1x128x128xf32, #tpu.memory_space<vmem>>, vector<1x128x128xf32>
    %5 = vector.shape_cast %4 : vector<1x128x128xf32> to vector<128x128xf32>
    %c0_5 = arith.constant 0 : index
    %c0_6 = arith.constant 0 : index
    %c0_7 = arith.constant 0 : index
    %6 = vector.load %arg6[%c0_5, %c0_6, %c0_7] : memref<1x1x128xf32, #tpu.memory_space<vmem>>, vector<1x1x128xf32>
    %7 = vector.shape_cast %6 : vector<1x1x128xf32> to vector<1x128xf32>
    %c0_8 = arith.constant 0 : index
    %c0_9 = arith.constant 0 : index
    %c0_10 = arith.constant 0 : index
    %8 = vector.load %arg4[%c0_8, %c0_9, %c0_10] : memref<1x16x1xf32, #tpu.memory_space<vmem>>, vector<1x16x1xf32>
    %9 = vector.shape_cast %8 : vector<1x16x1xf32> to vector<16x1xf32>
    %cst = arith.constant dense<0.000000e+00> : vector<16x128xf32>
    %10 = tpu.matmul %3, %5, %cst {dimension_numbers = #tpu.dot_dimension_numbers<[1], [0], [0], [1], [0, 0, 1, 1], [], []>} : vector<16x128xf32>, vector<128x128xf32>, vector<16x128xf32> -> vector<16x128xf32>
    %c0_11 = arith.constant 0 : index
    %c0_12 = arith.constant 0 : index
    %11 = vector.load %arg9[%c0_11, %c0_12] : memref<16x1xf32, #tpu.memory_space<vmem>>, vector<16x1xf32>
    %12 = vector.broadcast %11 : vector<16x1xf32> to vector<16x128xf32>
    %13 = arith.mulf %12, %10 : vector<16x128xf32>
    %c0_13 = arith.constant 0 : index
    %c0_14 = arith.constant 0 : index
    %14 = vector.load %arg8[%c0_13, %c0_14] : memref<16x16xf32, #tpu.memory_space<vmem>>, vector<16x16xf32>
    %cst_15 = arith.constant dense<0.000000e+00> : vector<16x128xf32>
    %15 = tpu.matmul %14, %13, %cst_15 {dimension_numbers = #tpu.dot_dimension_numbers<[1], [0], [0], [1], [0, 0, 1, 1], [], []>} : vector<16x16xf32>, vector<16x128xf32>, vector<16x128xf32> -> vector<16x128xf32>
    %16 = vector.broadcast %7 : vector<1x128xf32> to vector<16x128xf32>
    %17 = arith.addf %15, %16 : vector<16x128xf32>
    %18 = vector.broadcast %9 : vector<16x1xf32> to vector<16x128xf32>
    %19 = arith.mulf %17, %18 : vector<16x128xf32>
    %c5_i32 = arith.constant 5 : i32
    %20 = arith.cmpi ne, %arg1, %c5_i32 : i32
    %21 = arith.extui %20 : i1 to i32
    %c0_i32_16 = arith.constant 0 : i32
    %22 = arith.cmpi ne, %21, %c0_i32_16 : i32
    scf.if %22 {
      %cst_19 = arith.constant 0.000000e+00 : f32
      %26 = vector.broadcast %cst_19 : f32 to vector<16x128xf32>
      %27 = arith.maximumf %19, %26 : vector<16x128xf32>
      %c0_20 = arith.constant 0 : index
      %c0_21 = arith.constant 0 : index
      %28 = vector.load %arg10[%c0_20, %c0_21] : memref<16x128xf32, #tpu.memory_space<vmem>>, vector<16x128xf32>
      tpu.vector_store %arg10[%c0_20, %c0_21], %27 {strides = array<i32>} : memref<16x128xf32, #tpu.memory_space<vmem>>, vector<16x128xf32>,
    } else {
    }
    %c5_i32_17 = arith.constant 5 : i32
    %23 = arith.cmpi eq, %arg1, %c5_i32_17 : i32
    %24 = arith.extui %23 : i1 to i32
    %c0_i32_18 = arith.constant 0 : i32
    %25 = arith.cmpi ne, %24, %c0_i32_18 : i32
    scf.if %25 {
      %c0_19 = arith.constant 0 : index
      %c0_20 = arith.constant 0 : index
      %c0_21 = arith.constant 0 : index
      %26 = vector.load %arg7[%c0_19, %c0_20, %c0_21] : memref<1x16x128xf32, #tpu.memory_space<vmem>>, vector<1x16x128xf32>
      %27 = vector.shape_cast %26 : vector<1x16x128xf32> to vector<16x128xf32>
      %28 = vector.shape_cast %19 : vector<16x128xf32> to vector<1x16x128xf32>
      tpu.vector_store %arg7[%c0_19, %c0_20, %c0_21], %28 {strides = array<i32>} : memref<1x16x128xf32, #tpu.memory_space<vmem>>, vector<1x16x128xf32>,
    } else {
    }
    return
  }
  func.func @transform_0(%arg0: i32, %arg1: i32) -> (i32, i32, i32) {
    %c0_i32 = arith.constant 0 : i32
    %c0_i32_0 = arith.constant 0 : i32
    %c0_i32_1 = arith.constant 0 : i32
    return %arg0, %c0_i32, %c0_i32_0 : i32, i32, i32
  }
  func.func @transform_1(%arg0: i32, %arg1: i32) -> (i32, i32, i32) {
    %c0_i32 = arith.constant 0 : i32
    %c0_i32_0 = arith.constant 0 : i32
    %c0_i32_1 = arith.constant 0 : i32
    return %arg0, %c0_i32, %c0_i32_0 : i32, i32, i32
  }
  func.func @transform_2(%arg0: i32, %arg1: i32) -> (i32, i32, i32) {
    %c0_i32 = arith.constant 0 : i32
    %c0_i32_0 = arith.constant 0 : i32
    %c0_i32_1 = arith.constant 0 : i32
    return %arg0, %c0_i32, %c0_i32_0 : i32, i32, i32
  }
  func.func @transform_3(%arg0: i32, %arg1: i32) -> (i32, i32, i32) {
    %c0_i32 = arith.constant 0 : i32
    %c0_i32_0 = arith.constant 0 : i32
    %c0_i32_1 = arith.constant 0 : i32
    return %arg1, %c0_i32, %c0_i32_0 : i32, i32, i32
  }
  func.func @transform_4(%arg0: i32, %arg1: i32) -> (i32, i32, i32) {
    %c0_i32 = arith.constant 0 : i32
    %c0_i32_0 = arith.constant 0 : i32
    %c0_i32_1 = arith.constant 0 : i32
    return %arg1, %c0_i32, %c0_i32_0 : i32, i32, i32
  }
  func.func @transform_5(%arg0: i32, %arg1: i32) -> (i32, i32, i32) {
    %c0_i32 = arith.constant 0 : i32
    %c0_i32_0 = arith.constant 0 : i32
    %c0_i32_1 = arith.constant 0 : i32
    return %arg0, %c0_i32, %c0_i32_0 : i32, i32, i32
  }
}

</mosaic_0001>

<bundles_post_ra>
// kernel: tpu_custom_call.1
= control target key start
LH: loop header
LB: loop body
LE: loop exit
PB: predicated region body
PF: predicated region fallthrough
CT: control target
= control target key end

     0   :  { %s1428_s0 = inlined_call_operand.vmem [shape: f32[2,16,128], index: 0, kind: input, shape index: {}]   ;;  %s1429_s1 = inlined_call_operand.hbm [shape: f32[2,16,16], index: 1, kind: input, shape index: {}]   ;;  %s1430_s2 = inlined_call_operand.vmem [shape: f32[2,16,1], index: 2, kind: input, shape index: {}]   ;;  %s1431_s3 = inlined_call_operand.hbm [shape: f32[6,128,128], index: 3, kind: input, shape index: {}]   ;;  %s1432_s4 = inlined_call_operand.hbm [shape: f32[6,1,128], index: 4, kind: input, shape index: {}]   ;;  %s1433_s5 = inlined_call_operand.hbm [shape: f32[2,16,128], index: 5, kind: output, shape index: {}]  }
   0x1   :  { %1447 = sst [smem:[#allocation26_spill]] %s1428_s0 }
   0x2   :  { %1448 = sst [smem:[#allocation27_spill]] %s1430_s2 }
   0x3   :  { %1449 = sst [smem:[#allocation28_spill]] %s1431_s3 }
   0x4   :  { %1450 = sst [smem:[#allocation29_spill]] %s1433_s5 }
   0x5   :  { %10 = vsyncpa [#allocation6], 0 }
   0x6   :  { %12 = vsyncpa [#allocation6 + $0x1], 0 }
   0x7   :  { %13 = vsyncpa [#allocation9], 0 }
   0x8   :  { %15 = vsyncpa [#allocation9 + $0x1], 0 }
   0x9   :  { %16 = vsyncpa [#allocation7], 0 }
   0xa   :  { %18 = vsyncpa [#allocation7 + $0x1], 0  ;;  %s1134_s18 = smov 0   ;;  %s1136_s19 = smov 0  }
   0xb   :  { %s1138_s20 = smov 0   ;;  %s1140_s21 = smov 0  }
   0xc   :  { %s1142_s22 = smov 0   ;;  %s1144_s23 = smov 0  }
   0xd   :  { %s1146_s24 = smov 0   ;;  %s1148_s25 = smov 0  }
   0xe   :  { %s1150_s26 = smov 0   ;;  %s1152_s27 = smov 0  }
   0xf   :  { %s1154_s28 = smov 0  }
  0x10 LB: > { %1451 = sst [smem:[#allocation15_spill]] %s1069_s21  ;;  %s1188_s29 = sadd.s32 4294967295, %s1097_s28   ;;  %s1097_s28 = sphi %s1154_s28, %s24_s28   ;;  %s1093_s27 = sphi %s1152_s27, %s1500_s27   ;;  %s1089_s26 = sphi %s1150_s26, %s1499_s26   ;;  %s1085_s25 = sphi %s1148_s25, %s1490_s25   ;;  %s1081_s24 = sphi %s1146_s24, %s1498_s24   ;;  %s1077_s23 = sphi %s1144_s23, %s1489_s23   ;;  %s1073_s22 = sphi %s1142_s22, %s1497_s22   ;;  %s1069_s21 = sphi %s1140_s21, %s1496_s21   ;;  %s1065_s20 = sphi %s1138_s20, %s1495_s20   ;;  %s1061_s19 = sphi %s1136_s19, %s1494_s19   ;;  %s1057_s18 = sphi %s1134_s18, %s1493_s18  }
  0x11   : > { %1452 = sst [smem:[#allocation16_spill]] %s1077_s23  ;;  %s33_s30 = sadd.s32 1, %s1089_s26 }
  0x12   : > { %1453 = sst [smem:[#allocation17_spill]] %s1081_s24  ;;  %p1191_p0 = scmp.ge.s32.totalorder %s33_s30, 6 }
  0x13   : > { %1454 = sst [smem:[#allocation18_spill]] %s1085_s25  ;;  %p77_p1 = scmp.eq.s32.totalorder %s1097_s28, 0 }
  0x14   : > { %1455 = sst [smem:[#allocation19_spill]] %s1093_s27  ;;  %p83_p2 = scmp.eq.s32.totalorder %s1188_s29, 0 }
  0x15   : > { %s121_s7 = sadd.s32 1, %s1065_s20  ;;  %s1502_s30 = smov (%p1191_p0, %s33_s30), 0 }
  0x16   : > { %1457 = sst [smem:[#allocation20_spill]] %s1502_s30  ;;  %p128_p3 = scmp.ne.s32.totalorder %s1065_s20, %s1061_s19 }
  0x17   : > { %p134_p4 = scmp.ne.s32.totalorder %s1061_s19, %s1057_s18  ;;  %s118_s8 = ssub.s32 %s1089_s26, %s1502_s30 }
  0x18   : > { %p119_p5 = scmp.eq.s32.totalorder %s118_s8, 0  ;;  %p1209_p6 = por %p128_p3, %p77_p1 }
  0x19   : > { %p1215_p7 = por %p134_p4, %p83_p2  ;;  %p779_p8 = scmp.lt.s32.totalorder %s1097_s28, 12 }
  0x1a   : > { %s1221_s11 = scalar_select %p119_p5, %s1065_s20, %s121_s7  }
  0x1b   : > { %s248_s12 = sand.u32 1, %s1097_s28   ;;  %s1435_s13 = sand.u32 1, %s1065_s20  }
  0x1c   : > { %1460 = sst [smem:[#allocation21_spill]] %s1221_s11  ;;  %s715_s14 = sshll.u32 %s1435_s13, 7 }
  0x1d   : > { %s737_s15 = sshll.u32 %s1089_s26, 7  ;;  %s1461_s3 = sld [smem:[#allocation28_spill]] }
  0x1e   : > { %s252_s8 = scalar_lea.vmem [#allocation8], %s715_s14  ;;  %p1235_p9 = pnand %p779_p8, %p1209_p6 }
  0x1f   : > { %s260_s30 = sshll.u32 %s252_s8, 4  ;;  %p718_p10 = scmp.ge.s32.totalorder %s1097_s28, 1  ;;  %s261_s30 = int_to_ptr.vmem [resolvable:$true] %s260_s30 }
  0x20   : > { %p285_p11 = scmp.lt.s32.totalorder %s1097_s28, 13  ;;  %s1241_s14 = scalar_lea.sflag [#allocation9], %s248_s12 }
  0x21   : > { %s1437_s16 = smov 8   ;;  %s709_s17 = sadd.s32 4294967294, %s1097_s28  }
  0x22   : > { %p1249_p12 = pnand %p718_p10, %p285_p11  ;;  %s69_s12 = sadd.s32 1, %s1077_s23 }
  0x23   : > { %s257_s18 = scalar_lea.hbm %s1461_s3, %s737_s15  ;;  %s1436_s15 = smov 128  }
  0x24   : > { %s258_s7 = sshll.u32 %s257_s18, 4  ;;  %s36_s18 = sadd.s32 1, %s1093_s27  ;;  %s259_s7 = int_to_ptr.hbm [resolvable:$true] %s258_s7 }
  0x25   : > { %771 = dma.hbm_to_vmem [thread:$0]  (!%p1235_p9), %s259_s7, 2048, %s261_s30, %s1241_s14, %s1436_s15, %s1436_s15, %s1437_s16  }
  0x26   : > { %s1504_s18 = smov (!%p1191_p0, %s36_s18), %s1093_s27  ;;  %p76_p13 = scmp.ne.s32.totalorder %s1077_s23, %s1073_s22 }
  0x27   : > { %p38_p3 = scmp.ge.s32.totalorder %s1504_s18, 2  ;;  %p82_p4 = scmp.ne.s32.totalorder %s1073_s22, %s1069_s21 }
  0x28   : > { %p1265_p5 = por %p77_p1, %p76_p13  ;;  %p184_p6 = scmp.eq.s32.totalorder %s1188_s29, 11 }
  0x29   : > { %s1506_s18 = smov (%p38_p3, %s1504_s18), 0  ;;  %p1274_p10 = por %p83_p2, %p82_p4 }
  0x2a   : > { %1465 = sst [smem:[#allocation22_spill]] %s1506_s18  ;;  %p1278_p0 = por %p184_p6, %p76_p13 }
  0x2b   : > { %s66_s7 = ssub.s32 %s1093_s27, %s1506_s18  ;;  %p190_p1 = scmp.eq.s32.totalorder %s709_s17, 11 }
  0x2c   : > { %s1467_s6 = scalar_select %p1278_p0, 1, 0 }
  0x2d   : > { %p67_p11 = scmp.eq.s32.totalorder %s66_s7, 0  ;;  %s218_s15 = sand.u32 1, %s1077_s23  }
  0x2e   : > { %1468 = sst [smem:[#allocation23_spill]] %s1467_s6  ;;  %p1285_p3 = por %p190_p1, %p82_p4 }
  0x2f   : > { %s1290_s3 = scalar_select %p67_p11, %s1077_s23, %s69_s12  }
  0x30   : > { %s1469_s16 = scalar_select %p1285_p3, 1, 0 }
  0x31   : > { %1471 = sst [smem:[#allocation25_spill]] %s1290_s3  ;;  %s712_s11 = sshll.u32 %s218_s15, 4 }
  0x32   : > { %1470 = sst [smem:[#allocation24_spill]] %s1469_s16  ;;  %s736_s21 = sshll.u32 %s1093_s27, 4 }
  0x33   : > { %s227_s6 = scalar_lea.hbm %s1429_s1, %s736_s21  ;;  %s222_s18 = scalar_lea.vmem [#allocation5], %s712_s11 }
  0x34   : > { %s228_s2 = sshll.u32 %s227_s6, 4  ;;  %s230_s0 = sshll.u32 %s222_s18, 4  ;;  %s229_s2 = int_to_ptr.hbm [resolvable:$true] %s228_s2  ;;  %s231_s0 = int_to_ptr.vmem [resolvable:$true] %s230_s0 }
  0x35   : > { %p766_p2 = pnand %p779_p8, %p1265_p5  ;;  %s276_s12 = scalar_lea.hbm %s1432_s4, %s1089_s26 }
  0x36   : > { %s1472_s3 = sand.u32 1, %s1065_s20   ;;  %s278_s16 = sshll.u32 %s276_s12, 4  ;;  %s279_s16 = int_to_ptr.hbm [resolvable:$true] %s278_s16 }
  0x37   : > { %s273_s27 = scalar_lea.vmem [#allocation10], %s1472_s3  ;;  %s219_s5 = scalar_lea.sflag [#allocation6], %s218_s15 }
  0x38   : > { %s280_s23 = sshll.u32 %s273_s27, 4  ;;  %s1473_s24 = smov 8   ;;  %s281_s23 = int_to_ptr.vmem [resolvable:$true] %s280_s23 }
  0x39   : > { %s1474_s25 = smov 128   ;;  %289 = sbr.rel (%p1249_p12) target bundleno = 585 (0x249), region = 40 }
  0x3a   : > { %768 = dma.hbm_to_vmem [thread:$0]  (!%p766_p2), %s229_s2, 256, %s231_s0, %s219_s5, %s1474_s25, %s1474_s25, %s1473_s24  }
  0x3b   : > { %774 = dma.hbm_to_vmem [thread:$0]  (!%p1235_p9), %s279_s16, 16, %s281_s23, %s1241_s14  }
  0x3c   : > { %s1315_s21 = sand.u32 (!%p1249_p12), 1, %s1073_s22  }
  0x3d   : > { %s719_s3 = sshll.u32 (!%p1249_p12), %s1315_s21, 4  ;;  %s292_s27 = scalar_lea.sflag (!%p1249_p12), [#allocation6], %s1315_s21 }
  0x3e   : > { %s295_s11 = scalar_lea.vmem [#allocation5], %s719_s3 }
  0x3f   : > { %1044 = dma.done.wait (%p1274_p10), %s292_s27, 256  }
  0x40   : > { %1046 = vsyncadd (%p1274_p10), %s292_s27, 4294967040  ;;  %s301_s0 = sand.u32 1, %s1188_s29   ;;  %s303_s2 = sand.u32 1, %s1061_s19  }
  0x41   : > { %s720_s23 = sshll.u32 %s303_s2, 7  ;;  %s302_s25 = scalar_lea.sflag [#allocation9], %s301_s0 }
  0x42   : > { %s1325_s13 = scalar_lea.vmem [#allocation8], %s720_s23 }
  0x43   : > { %1048 = dma.done.wait (%p1215_p7), %s302_s25, 2064  }
  0x44   : > { %1050 = vsyncadd (%p1215_p7), %s302_s25, 4294965232  ;;  %s1475_s14 = sld [smem:[#allocation18_spill]]  ;;  %s1341_s7 = scalar_lea.vmem [#allocation10], %s303_s2 }
  0x45   : > { %s1476_s18 = sld [smem:[#allocation26_spill]]  ;;  %s1343_s12 = scalar_lea.vmem [#allocation11], %s719_s3 }
  0x46   : > { %s1477_s6 = sld [smem:[#allocation27_spill]] }
  0x47   : > { %s1478_s10 = sld [smem:[#allocation17_spill]] }
  0x4a   : > { %p361_p8 = scmp.lt.s32.totalorder %s1475_s14, 1 }
  0x4c   : > { %s1508_s14 = smov (!%p361_p8, %s1475_s14), 1 }
  0x4d   : > { %s738_s15 = sshll.u32 %s1508_s14, 4  ;;  %p726_p7 = scmp.ne.s32.totalorder %s1478_s10, 0 }
  0x4e   : > { %s365_s8 = scalar_lea.vmem %s1476_s18, %s738_s15  ;;  %s1339_s17 = scalar_lea.vmem %s1477_s6, %s738_s15 }
  0x4f   : > { %374 = sbr.rel (%p726_p7) target bundleno = 238 (0xee), region = 56 }
  0x54   : > { %v377_v0 = vlaneseq  ;;  %v375_v1 = vld [vmem:[%s295_s11] sm:$0xff]  ;;  %vm386_vm0 = vcmask 130048   ;;  %v376_v7 = vld [vmem:[%s295_s11 + $0x8] sm:$0xff]  ;;  %vm419_vm4 = vcmask 7168  }
  0x55   : > { %v422_v10 = vld [vmem:[%s365_s8] sm:$0xff]  ;;  %v423_v11 = vld [vmem:[%s365_s8 + $0x8] sm:$0xff] }
  0x56   : > { %v378_v2 = vshrl.u32 %v377_v0, 7  ;;  %v381_v3 = vand.u32 127, %v377_v0  ;;  %424 = vst [vmem:[#allocation4] sm:$0xff] %v422_v10 }
  0x57   : > { %425 = vst [vmem:[#allocation4 + $0x8] sm:$0xff] %v423_v11 }
  0x58   : > { %vm382_vm1 = vcmp.eq.s32.totalorder %v378_v2, %v381_v3  ;;  %v379_v4 = vadd.s32 8, %v378_v2 }
  0x59   : > { %v384_v5 = vsel %vm382_vm1, 1.0, %v375_v1 }
  0x5a   : > { %v387_v6 = vsel %vm386_vm0, %v384_v5, 0.0  ;;  %vm383_vm2 = vcmp.eq.s32.totalorder %v379_v4, %v381_v3 }
  0x5b   : > { %388 = vadd.xlane.f32.xlu0 %v387_v6  ;;  %v385_v8 = vsel %vm383_vm2, 1.0, %v376_v7 }
  0x5c   : > { %v390_v9 = vsel %vm386_vm0, %v385_v8, 0.0 }
  0x63   : > { %391 = vadd.xlane.f32.xlu0 %v390_v9 }
  0xce   : > { %v389_v12 = vpop.xlane.xlu0 %388 }
  0xcf   : > { %v393_v13 = vmax.f32 %v389_v12, 1.0 }
  0xd1   : > { %874 = vrsqrt.f32 %v393_v13  ;;  %vm401_vm5 = vweird.f32 %v393_v13 }
  0xd6   : > { %v392_v14 = vpop.xlane.xlu0 %391 }
  0xd7   : > { %v875_v15 = vpop.eup %874  ;;  %v394_v16 = vmax.f32 %v392_v14, 1.0 }
  0xd8   : > { %v396_v17 = vmul.f32 %v875_v15, %v393_v13  ;;  %vm402_vm3 = vweird.f32 %v875_v15 }
  0xd9   : > { %876 = vrsqrt.f32 %v394_v16  ;;  %vm403_vm6 = vmor %vm401_vm5, %vm402_vm3  ;;  %vm411_vm8 = vweird.f32 %v394_v16 }
  0xda   : > { %v397_v18 = vmul.f32 %v875_v15, %v396_v17 }
  0xdc   : > { %v398_v19 = vmul.f32 0.5, %v397_v18 }
  0xde   : > { %v399_v20 = vsub.f32 1.5, %v398_v19 }
  0xdf   : > { %v877_v21 = vpop.eup %876 }
  0xe0   : > { %v400_v22 = vmul.f32 %v875_v15, %v399_v20  ;;  %v406_v23 = vmul.f32 %v877_v21, %v394_v16  ;;  %vm412_vm7 = vweird.f32 %v877_v21 }
  0xe1   : > { %vm413_vm9 = vmor %vm411_vm8, %vm412_vm7 }
  0xe2   : > { %v404_v24 = vsel %vm403_vm6, %v875_v15, %v400_v22  ;;  %v407_v25 = vmul.f32 %v877_v21, %v406_v23 }
  0xe3   : > { %v415_v26 = vmul.f32 %v404_v24, %v384_v5  ;;  %420 = vst.msk [vmem:[#allocation3] sm:$0xff] %vm419_vm4, %v404_v24 }
  0xe4   : > { %v408_v27 = vmul.f32 0.5, %v407_v25 }
  0xe5   : > { %417 = vst.msk [vmem:[#allocation2] sm:$0xff] %vm386_vm0, %v415_v26 }
  0xe6   : > { %v409_v28 = vsub.f32 1.5, %v408_v27 }
  0xe8   : > { %v410_v29 = vmul.f32 %v877_v21, %v409_v28 }
  0xea   : > { %v414_v30 = vsel %vm413_vm9, %v877_v21, %v410_v29 }
  0xeb   : > { %v416_v31 = vmul.f32 %v414_v30, %v385_v8  ;;  %421 = vst.msk [vmem:[#allocation3 + $0x8] sm:$0xff] %vm419_vm4, %v414_v30 }
  0xed   : > { %418 = vst.msk [vmem:[#allocation2 + $0x8] sm:$0xff] %vm386_vm0, %v416_v31 }
  0xee PF: > { %v443_v32 = vld [vmem:[%s1325_s13 + $0x78] sm:$0xff]  ;;  %v442_v33 = vld [vmem:[%s1325_s13 + $0x70] sm:$0xff]  ;;  %v441_v34 = vld [vmem:[%s1325_s13 + $0x68] sm:$0xff]  ;;  %v1101_v35 = vmov 0   ;;  %vm489_vm10 = vcmask 130048   ;;  %s1479_s5 = sld [smem:[#allocation17_spill]] }
  0xef   : > { %447 = vmatpush.msra.mxu0 %v443_v32  ;;  %741 = vmatpush.msra.mxu2 %v443_v32  ;;  %v440_v36 = vld [vmem:[%s1325_s13 + $0x60] sm:$0xff]  ;;  %v439_v37 = vld [vmem:[%s1325_s13 + $0x58] sm:$0xff]  ;;  %v438_v39 = vld [vmem:[%s1325_s13 + $0x50] sm:$0xff] }
  0xf0   : > { %878 = vset.pattern.permute.xlu0 %v1101_v35  ;;  %879 = vset.pattern.permute.xlu1 %v1101_v35  ;;  %v437_v40 = vld [vmem:[%s1325_s13 + $0x48] sm:$0xff]  ;;  %v436_v41 = vld [vmem:[%s1325_s13 + $0x40] sm:$0xff]  ;;  %v435_v43 = vld [vmem:[%s1325_s13 + $0x38] sm:$0xff] }
  0xf1   : > { %448 = vmatpush.msra.mxu0 %v442_v33  ;;  %742 = vmatpush.msra.mxu2 %v442_v33  ;;  %v470_v42 = vld [vmem:[#allocation3] sm:$0xff]  ;;  %v434_v44 = vld [vmem:[%s1325_s13 + $0x30] sm:$0xff]  ;;  %v433_v45 = vld [vmem:[%s1325_s13 + $0x28] sm:$0xff] }
  0xf2   : > { %v471_v38 = vld [vmem:[#allocation3 + $0x8] sm:$0xff]  ;;  %v432_v46 = vld [vmem:[%s1325_s13 + $0x20] sm:$0xff]  ;;  %v431_v47 = vld [vmem:[%s1325_s13 + $0x18] sm:$0xff] }
  0xf3   : > { %449 = vmatpush.msra.mxu0 %v441_v34  ;;  %743 = vmatpush.msra.mxu2 %v441_v34  ;;  %v430_v48 = vld [vmem:[%s1325_s13 + $0x10] sm:$0xff]  ;;  %v429_v49 = vld [vmem:[%s1325_s13 + $0x8] sm:$0xff]  ;;  %v428_v50 = vld [vmem:[%s1325_s13] sm:$0xff] }
  0xf4   : > { %479 = vperm.xlu0 %878, %v471_v38   ;;  %v426_v51 = vld [vmem:[#allocation4] sm:$0xff]  ;;  %v427_v52 = vld [vmem:[#allocation4 + $0x8] sm:$0xff]  ;;  %p729_p9 = scmp.eq.s32.totalorder %s1479_s5, 5 }
  0xf5   : > { %450 = vmatpush.msra.mxu0 %v440_v36  ;;  %744 = vmatpush.msra.mxu2 %v440_v36  ;;  %v445_v53 = vld [vmem:[%s1339_s17] sm:$0xff]  ;;  %v446_v54 = vld [vmem:[%s1339_s17 + $0x8] sm:$0xff] }
  0xf6   : > { %521 = vperm.xlu1 %879, %v445_v53   ;;  %v484_v61 = vld [vmem:[#allocation2] sm:$0xff]  ;;  %v485_v62 = vld [vmem:[#allocation2 + $0x8] sm:$0xff] }
  0xf7   : > { %451 = vmatpush.msra.mxu0 %v439_v37  ;;  %745 = vmatpush.msra.mxu2 %v439_v37  ;;  %v880_v63 = vld [vmem:[%s1341_s7] ss:$0 sm:$0xff] }
  0xf9   : > { %452 = vmatpush.msra.mxu0 %v438_v39  ;;  %746 = vmatpush.msra.mxu2 %v438_v39 }
  0xfb   : > { %453 = vmatpush.msra.mxu0 %v437_v40  ;;  %747 = vmatpush.msra.mxu2 %v437_v40 }
  0xfc   : > { %474 = vperm.xlu0 %878, %v470_v42  }
  0xfd   : > { %454 = vmatpush.msra.mxu0 %v436_v41  ;;  %748 = vmatpush.msra.mxu2 %v436_v41 }
  0xfe   : > { %526 = vperm.xlu1 %879, %v446_v54  }
  0xff   : > { %455 = vmatpush.msra.mxu0 %v435_v43  ;;  %749 = vmatpush.msra.mxu2 %v435_v43 }
 0x101   : > { %456 = vmatpush.msra.mxu0 %v434_v44  ;;  %750 = vmatpush.msra.mxu2 %v434_v44 }
 0x103   : > { %457 = vmatpush.msra.mxu0 %v433_v45  ;;  %751 = vmatpush.msra.mxu2 %v433_v45 }
 0x105   : > { %458 = vmatpush.msra.mxu0 %v432_v46  ;;  %752 = vmatpush.msra.mxu2 %v432_v46 }
 0x107   : > { %459 = vmatpush.msra.mxu0 %v431_v47  ;;  %753 = vmatpush.msra.mxu2 %v431_v47 }
 0x109   : > { %460 = vmatpush.msra.mxu0 %v430_v48  ;;  %754 = vmatpush.msra.mxu2 %v430_v48 }
 0x10b   : > { %461 = vmatpush.msra.mxu0 %v429_v49  ;;  %755 = vmatpush.msra.mxu2 %v429_v49 }
 0x10d   : > { %462 = vmatpush.msra.mxu0 %v428_v50  ;;  %756 = vmatpush.msra.mxu2 %v428_v50 }
 0x10e   : > { %463 = vmatmul.f32.vlgmr.msra.gmra.mxu0 %v426_v51  ;;  %466 = vmatmul.f32.vlgmr.msra.gmra.mxu2 %v427_v52 }
 0x166   : > { %v480_v55 = vpop.permute.xlu0 %479 }
 0x168   : > { %v522_v0 = vpop.permute.xlu1 %521 }
 0x16e   : > { %v475_v56 = vpop.permute.xlu0 %474 }
 0x170   : > { %v527_v6 = vpop.permute.xlu1 %526 }
 0x18b   : > { %v464_v57 = vpop.f32.mrf.mxu0 }
 0x18c   : > { %v482_v60 = vmul.f32 %v475_v56, %v464_v57 }
 0x191   : > { %v467_v58 = vpop.f32.mrf.mxu2 }
 0x192   : > { %v483_v59 = vmul.f32 %v480_v55, %v467_v58 }
 0x194   : > { %510 = vmatpush.msra.mxu1 %v483_v59 }
 0x196   : > { %511 = vmatpush.msra.mxu1 %v482_v60 }
 0x197   : > { %727 = vmatmul.msk.f32.vlgmr.msra.gmra.mxu1 %vm489_vm10, %v484_v61 }
 0x19f   : > { %728 = vmatmul.msk.f32.gmra.mxu1 %vm489_vm10, %v485_v62 }
 0x214   : > { %v513_v1 = vpop.f32.mrf.mxu1 }
 0x215   : > { %v514_v2 = vadd.f32 %v880_v63, %v513_v1 }
 0x217   : > { %v529_v3 = vmul.f32 %v522_v0, %v514_v2 }
 0x21b   : > { %534 = sbr.rel (%p729_p9) target bundleno = 548 (0x224), region = 60 }
 0x21c   : > { %v516_v4 = vpop.f32.mrf.mxu1 }
 0x21d   : > { %v517_v5 = vadd.f32 %v880_v63, %v516_v4 }
 0x21f   : > { %v530_v7 = vmul.f32 %v527_v6, %v517_v5 }
 0x220   : > { %v535_v8 = vmax.f32 %v529_v3, 0.0 }
 0x221   : > { %v536_v9 = vmax.f32 %v530_v7, 0.0 }
 0x222   : > { %537 = vst [vmem:[#allocation4] sm:$0xff] %v535_v8 }
 0x223   : > { %538 = vst [vmem:[#allocation4 + $0x8] sm:$0xff] %v536_v9 }
 0x224 PF: > { %s1480_s24 = sld [smem:[#allocation17_spill]] }
 0x22a   : > { %p730_p12 = scmp.ne.s32.totalorder %s1480_s24, 5 }
 0x22c   : > { %542 = sbr.rel (%p730_p12) target bundleno = 563 (0x233), region = 64 }
 0x231   : > { %543 = vst [vmem:[%s1343_s12] sm:$0xff] %v529_v3 }
 0x232   : > { %544 = vst [vmem:[%s1343_s12 + $0x8] sm:$0xff] %v530_v7 }
 0x233 PF: > { %s1481_s3 = sld [smem:[#allocation18_spill]]  ;;  %s558_s14 = sshll.u32 %s1343_s12, 4  ;;  %s559_s14 = int_to_ptr.vmem [resolvable:$true] %s558_s14 }
 0x234   : > { %s1483_s23 = sld [smem:[#allocation29_spill]]  ;;  %s546_s16 = scalar_lea.sflag [#allocation7], %s1315_s21 }
 0x239   : > { %s740_s11 = sshll.u32 %s1481_s3, 4 }
 0x23a   : > { %s1484_s13 = smov %s1483_s23  ;;  %s557_s25 = scalar_lea.hbm %s1483_s23, %s740_s11 }
 0x23b   : > { %s560_s15 = sshll.u32 %s557_s25, 4  ;;  %s991_s30 = scalar_lea.hbm %s1484_s13, 32  ;;  %s561_s15 = int_to_ptr.hbm [resolvable:$true] %s560_s15 }
 0x23c   : > { %s985_s9 = sshra.s32 %s561_s15, 4  ;;  %s986_s9 = int_to_ptr.hbm [resolvable:$true] %s985_s9 }
 0x23d   : > { %s987_s18 = scalar_lea.hbm %s986_s9, 16  ;;  %p992_p6 = scmp.lt.s32.totalorder %s986_s9, %s1484_s13 }
 0x23e   : > { %p988_p13 = scmp.ne.s32.totalorder %s986_s9, %s987_s18  ;;  %p993_p10 = scmp.lt.s32.totalorder %s991_s30, %s987_s18 }
 0x240   : > { %p989_p4 = pnand %p988_p13, %p1278_p0  ;;  %p994_p1 = por %p993_p10, %p992_p6 }
 0x242   : > { %p990_p5 = pneg %p989_p4 }
 0x244   : > { %p995_p11 = pnand %p994_p1, %p990_p5 }
 0x246   : > { %998 = shalt.err (!%p995_p11)
}
 0x247   : > { %s1102_s21 = smov 128   ;;  %s1103_s7 = smov 8  }
 0x248   : > { %763 = dma.vmem_to_hbm [thread:$0]  (%p1278_p0), %s559_s14, 256, %s561_s15, %s546_s16, %s1102_s21, %s1102_s21, %s1103_s7  }
 0x249 PF: > { %s1485_s12 = sld [smem:[#allocation15_spill]]  ;;  %p780_p2 = scmp.ge.s32.totalorder %s1097_s28, 2 }
 0x24b   : > { %p776_p8 = pnand %p780_p2, %p1285_p3 }
 0x24d   : > { %p777_p7 = pneg %p776_p8 }
 0x24f   : > { %s575_s5 = sand.u32 1, %s1485_s12  }
 0x250   : > { %s576_s24 = scalar_lea.sflag [#allocation7], %s575_s5 }
 0x251   : > { %1052 = dma.done.wait (%p777_p7), %s576_s24, 256  }
 0x252   : > { %1054 = vsyncadd (%p777_p7), %s576_s24, 4294967040  ;;  %s24_s28 = sadd.s32 1, %s1097_s28   ;;  %s1487_s3 = sld [smem:[#allocation21_spill]] }
 0x253   : > { %p21_p9 = scmp.ge.s32.totalorder %s24_s28, 14   ;;  %s1488_s27 = sld [smem:[#allocation16_spill]] }
 0x254   : > { %s1489_s23 = sld [smem:[#allocation25_spill]]  ;;  %s1493_s18 = smov %s1061_s19 }
 0x255   : > { %s1490_s25 = sld [smem:[#allocation19_spill]]  ;;  %s1494_s19 = smov %s1065_s20 }
 0x256   : > { %s1491_s11 = sld [smem:[#allocation20_spill]]  ;;  %s1496_s21 = smov %s1073_s22 }
 0x257   : > { %s1492_s0 = sld [smem:[#allocation22_spill]]  ;;  %s1498_s24 = smov %s1089_s26 }
 0x258   : > { %s1495_s20 = smov %s1487_s3 }
 0x259   : > { %s1497_s22 = smov %s1488_s27  ;;  %23 = sbr.rel (!%p21_p9) target bundleno = 16 (0x10), region = 127 }
 0x25c   : > { %s1499_s26 = smov %s1491_s11 }
 0x25d   : > { %s1500_s27 = smov %s1492_s0 }
 0x25e   :  { %582 = vsyncpa [#allocation6], 1 }
 0x25f   :  { %584 = vsyncpa [#allocation6 + $0x1], 1 }
 0x260   :  { %585 = vsyncpa [#allocation9], 1 }
 0x261   :  { %587 = vsyncpa [#allocation9 + $0x1], 1 }
 0x262   :  { %588 = vsyncpa [#allocation7], 1 }
 0x263   :  { %590 = vsyncpa [#allocation7 + $0x1], 1 }

</bundles_post_ra>
